<compile_context>
chip_gen: v6e
topology: v6e:2x2x1
jax: 0.10.0
libtpu: 0.0.40
codegen_flags: <defaults>
</compile_context>

<pallas_src>
import jax
import jax.numpy as jnp
from jax.experimental import pallas as pl
from jax.experimental.pallas import tpu as pltpu


def classifier_kernel(x_ref, wbt_ref, wfc_ref, bfc_ref, out_ref, pooled_acc):
    # x_ref      : (C_in, HW_tile)   f32  one image's channel-major spatial chunk
    # wbt_ref    : (C_feat, C_in)    bf16 backbone 1x1-conv weight (transposed)
    # wfc_ref    : (C_feat, Npad)    bf16 fc weight^T, pre-scaled by 1/HW, class-padded
    # bfc_ref    : (1, Npad)         f32  fc bias, class-padded
    # out_ref    : (1, Npad)         f32  logits row for this image (padded classes)
    # pooled_acc : (C_feat, 1)       f32  running sum over HW chunks (scratch)
    hw_i = pl.program_id(1)

    @pl.when(hw_i == 0)
    def _init():
        pooled_acc[...] = jnp.zeros_like(pooled_acc)

    # Backbone stage: 1x1 conv == channel contraction.  Single 2-D MXU matmul,
    # weight loaded once per kernel (grid-invariant block), HW_tile lane-dense.
    # x is cast to bf16 in-kernel (input streamed from HBM as f32).
    x = x_ref[...].astype(jnp.bfloat16)                              # (C_in, HW_tile)
    feat = jnp.dot(wbt_ref[...], x,
                   preferred_element_type=jnp.float32)               # (C_feat, HW_tile) f32
    feat = jnp.maximum(feat, 0.0)                                    # ReLU (VPU)

    # Partial AdaptiveAvgPool2d((1,1)): accumulate the HW-chunk sum (XLU lane
    # reduce).  The 1/HW scale is folded into wfc, so this stays a raw f32 sum.
    pooled_acc[...] += jnp.sum(feat, axis=-1, keepdims=True)         # (C_feat, 1)

    @pl.when(hw_i == pl.num_programs(1) - 1)
    def _finalize():
        # fc (nn.Linear): contract the f32 pooled sum with the (pre-scaled) fc
        # weight over C_feat via a f32 multiply + sublane reduce.  This keeps
        # the pooled vector in f32 and produces logits as a lane-dense row.
        w = wfc_ref[...].astype(jnp.float32)                         # (C_feat, Npad)
        logits = jnp.sum(pooled_acc[...] * w, axis=0, keepdims=True) # (1, Npad)
        out_ref[...] = (logits + bfc_ref[...]).astype(out_ref.dtype)


def _pick_hw_tile(hw, target):
    """Largest multiple of 128 that divides HW and is <= target (else full HW)."""
    if hw <= target or hw % 128 != 0:
        # TODO(synk): pad HW to a multiple of 128 for very large non-aligned maps.
        return hw
    t = (target // 128) * 128
    while t >= 128:
        if hw % t == 0:
            return t
        t -= 128
    return hw


def imagenet_classifier_forward(x_nchw, w_backbone, w_fc, b_fc, *,
                                hw_tile_target=2048):
    """x_nchw: (B, C_in, H, W) f32.  Returns (B, n_classes) f32 logits."""
    B, C_in, H, W = x_nchw.shape
    HW = H * W
    C_feat = w_backbone.shape[1]
    n_classes = w_fc.shape[0]

    # Native NCHW layout, spatial flattened: a free reshape, no HBM transpose,
    # no wrapper-side dtype cast (bf16 cast happens inside the kernel).
    x = x_nchw.reshape(B, C_in, HW)

    hw_tile = _pick_hw_tile(HW, hw_tile_target)
    n_hw = HW // hw_tile

    # Lane-dense fc weight / bias / output: pad classes to a multiple of 128.
    # Fold the 1/HW pooling average into the fc weight (one-time host transform).
    n_pad = pl.cdiv(n_classes, 128) * 128
    inv_hw = 1.0 / float(HW)
    wbt = w_backbone.T.astype(jnp.bfloat16)                          # (C_feat, C_in)
    w_fc_t = jnp.zeros((C_feat, n_pad), jnp.bfloat16)
    w_fc_t = w_fc_t.at[:, :n_classes].set((w_fc.T * inv_hw).astype(jnp.bfloat16))
    b_fc_p = jnp.zeros((1, n_pad), jnp.float32).at[:, :n_classes].set(b_fc)

    # Rough VMEM budget (double-buffered streams + resident weights + feat chunk)
    # so bigger HW tiles can be used on v5e/v6e without tripping the default
    # scoped-VMEM limit; clamped to 64 MiB (v7x physical per-TC ceiling).
    est = (2 * C_in * hw_tile * 4          # x blocks (f32)
           + 2 * n_pad * 4                 # out blocks
           + 2 * C_feat * C_in * 2         # backbone weight (bf16)
           + 2 * C_feat * n_pad * 2        # fc weight (bf16)
           + 2 * n_pad * 4                 # bias
           + C_feat * 4                    # pooled accumulator
           + C_feat * hw_tile * 4          # feat chunk (f32)
           + C_feat * n_pad * 4)           # fc product at finalize (f32)
    vmem_limit = int(min(max(2 * est, 32 * 1024 * 1024), 64 * 1024 * 1024))

    out = pl.pallas_call(
        classifier_kernel,
        out_shape=jax.ShapeDtypeStruct((B, 1, n_pad), jnp.float32),
        grid_spec=pltpu.PrefetchScalarGridSpec(
            num_scalar_prefetch=0,
            grid=(B, n_hw),                                   # batch, HW chunks (reduction last)
            in_specs=[
                pl.BlockSpec((None, C_in, hw_tile), lambda b, h: (b, 0, h)),
                pl.BlockSpec((C_feat, C_in), lambda b, h: (0, 0)),
                pl.BlockSpec((C_feat, n_pad), lambda b, h: (0, 0)),
                pl.BlockSpec((1, n_pad), lambda b, h: (0, 0)),
            ],
            out_specs=pl.BlockSpec((None, 1, n_pad), lambda b, h: (b, 0, 0)),
            scratch_shapes=[pltpu.VMEM((C_feat, 1), jnp.float32)],
        ),
        compiler_params=pltpu.CompilerParams(
            dimension_semantics=("parallel", "arbitrary"),
            vmem_limit_bytes=vmem_limit),
    )(x, wbt, w_fc_t, b_fc_p)

    return out.reshape(B, n_pad)[:, :n_classes]


def reference_forward_f32(x_nchw, w_backbone, w_fc, b_fc):
    """Pure-JAX f32 reference replicating the PyTorch module semantics."""
    feat = jnp.einsum("bchw,cf->bfhw", x_nchw, w_backbone)
    feat = jnp.maximum(feat, 0.0)
    pooled = jnp.mean(feat, axis=(2, 3))                    # avgpool(1,1) + flatten
    return pooled @ w_fc.T + b_fc                           # nn.Linear


def reference_forward_matched(x_nchw, w_backbone, w_fc, b_fc):
    """Reference matching the kernel's bf16-input / f32-accumulate precision."""
    B, C_in, H, W = x_nchw.shape
    HW = H * W
    x = x_nchw.reshape(B, C_in, HW).astype(jnp.bfloat16)
    wbt = w_backbone.T.astype(jnp.bfloat16)
    feat = jnp.maximum(
        jnp.einsum("fc,bch->bfh", wbt, x, preferred_element_type=jnp.float32), 0.0)
    pooled = jnp.sum(feat, axis=-1)                         # f32 sum over HW
    w_scaled = (w_fc.T * (1.0 / HW)).astype(jnp.bfloat16).astype(jnp.float32)
    return jnp.dot(pooled, w_scaled, precision=jax.lax.Precision.HIGHEST) + b_fc


if __name__ == "__main__":
    # Small shapes consistent with the module's forward.
    B, C_in, H, W = 2, 4, 16, 16
    C_feat = 32          # backbone.stages_n_channels[-1]
    n_classes = 16       # small stand-in for 1000

    key = jax.random.PRNGKey(0)
    k_x, k_wb, k_wfc, k_bfc = jax.random.split(key, 4)

    x = jax.random.normal(k_x, (B, C_in, H, W), dtype=jnp.float32)

    # He ("kaiming") init for the conv-like backbone weight; standard linear
    # init for the fc layer.
    w_backbone = jax.random.normal(k_wb, (C_in, C_feat), jnp.float32) * jnp.sqrt(2.0 / C_in)
    fc_bound = 1.0 / jnp.sqrt(C_feat)
    w_fc = jax.random.uniform(k_wfc, (n_classes, C_feat), jnp.float32,
                              minval=-fc_bound, maxval=fc_bound)
    b_fc = jax.random.uniform(k_bfc, (n_classes,), jnp.float32,
                              minval=-fc_bound, maxval=fc_bound)

    ref_m = reference_forward_matched(x, w_backbone, w_fc, b_fc)
    ref_f = reference_forward_f32(x, w_backbone, w_fc, b_fc)

    # Single HW chunk per image (hw_tile == HW).
    out = imagenet_classifier_forward(x, w_backbone, w_fc, b_fc)
    out = jax.block_until_ready(out)
    assert out.shape == (B, n_classes)
    assert jnp.allclose(out, ref_m, atol=1e-2, rtol=1e-2)
    assert jnp.allclose(out, ref_f, atol=3e-2, rtol=3e-2)

    # Multi-chunk path: exercise the pooled-sum accumulator (2 HW chunks of 128).
    out2 = imagenet_classifier_forward(x, w_backbone, w_fc, b_fc, hw_tile_target=128)
    out2 = jax.block_until_ready(out2)
    assert out2.shape == (B, n_classes)
    assert jnp.allclose(out2, ref_m, atol=1e-2, rtol=1e-2)
    assert jnp.allclose(out2, ref_f, atol=3e-2, rtol=3e-2)

    print("KERNEL_OK")
</pallas_src>

<mosaic_0001>
module attributes {stable_mosaic.version = 11 : i64} {
  func.func @classifier_kernel(%arg0: i32, %arg1: i32, %arg2: memref<1x4x256xf32, #tpu.memory_space<vmem>>, %arg3: memref<32x4xbf16, #tpu.memory_space<vmem>>, %arg4: memref<32x128xbf16, #tpu.memory_space<vmem>>, %arg5: memref<1x128xf32, #tpu.memory_space<vmem>>, %arg6: memref<1x1x128xf32, #tpu.memory_space<vmem>>, %arg7: memref<32x1xf32, #tpu.memory_space<vmem>>) attributes {dimension_semantics = [#tpu.dimension_semantics<parallel>, #tpu.dimension_semantics<arbitrary>], iteration_bounds = array<i64: 2, 1>, scalar_prefetch = 0 : i64, scratch_operands = 1 : i64, tpu.core_type = #tpu.core_type<tc>, window_params = [{transform_indices = @transform_0, window_bounds = array<i64: 1, 4, 256>}, {pipeline_mode = #tpu.pipeline_mode<synchronous>, transform_indices = @transform_1, window_bounds = array<i64: 32, 4>}, {pipeline_mode = #tpu.pipeline_mode<synchronous>, transform_indices = @transform_2, window_bounds = array<i64: 32, 128>}, {pipeline_mode = #tpu.pipeline_mode<synchronous>, transform_indices = @transform_3, window_bounds = array<i64: 1, 128>}, {transform_indices = @transform_4, window_bounds = array<i64: 1, 1, 128>}]} {
    %c0_i32 = arith.constant 0 : i32
    %0 = arith.cmpi eq, %arg1, %c0_i32 : i32
    %1 = arith.extui %0 : i1 to i32
    %c0_i32_0 = arith.constant 0 : i32
    %2 = arith.cmpi ne, %1, %c0_i32_0 : i32
    scf.if %2 {
      %cst_13 = arith.constant 0.000000e+00 : f32
      %18 = vector.broadcast %cst_13 : f32 to vector<32x1xf32>
      %c0_14 = arith.constant 0 : index
      %c0_15 = arith.constant 0 : index
      %19 = vector.load %arg7[%c0_14, %c0_15] : memref<32x1xf32, #tpu.memory_space<vmem>>, vector<32x1xf32>
      tpu.vector_store %arg7[%c0_14, %c0_15], %18 {strides = array<i32>} : memref<32x1xf32, #tpu.memory_space<vmem>>, vector<32x1xf32>,
    } else {
    }
    %c0 = arith.constant 0 : index
    %c0_1 = arith.constant 0 : index
    %c0_2 = arith.constant 0 : index
    %3 = vector.load %arg2[%c0, %c0_1, %c0_2] : memref<1x4x256xf32, #tpu.memory_space<vmem>>, vector<1x4x256xf32>
    %4 = vector.shape_cast %3 : vector<1x4x256xf32> to vector<4x256xf32>
    %5 = arith.truncf %4 : vector<4x256xf32> to vector<4x256xbf16>
    %c0_3 = arith.constant 0 : index
    %c0_4 = arith.constant 0 : index
    %6 = vector.load %arg3[%c0_3, %c0_4] : memref<32x4xbf16, #tpu.memory_space<vmem>>, vector<32x4xbf16>
    %cst = arith.constant dense<0.000000e+00> : vector<32x256xf32>
    %7 = tpu.matmul %6, %5, %cst {dimension_numbers = #tpu.dot_dimension_numbers<[1], [0], [0], [1], [0, 0, 1, 1], [], []>} : vector<32x4xbf16>, vector<4x256xbf16>, vector<32x256xf32> -> vector<32x256xf32>
    %cst_5 = arith.constant 0.000000e+00 : f32
    %8 = vector.broadcast %cst_5 : f32 to vector<32x256xf32>
    %9 = arith.maximumf %7, %8 : vector<32x256xf32>
    %c0_6 = arith.constant 0 : index
    %c0_7 = arith.constant 0 : index
    %10 = vector.load %arg7[%c0_6, %c0_7] : memref<32x1xf32, #tpu.memory_space<vmem>>, vector<32x1xf32>
    %cst_8 = arith.constant dense<0.000000e+00> : vector<32xf32>
    %11 = vector.multi_reduction <add>, %9, %cst_8 [1] : vector<32x256xf32> to vector<32xf32>
    %12 = vector.shape_cast %11 : vector<32xf32> to vector<32x1xf32>
    %13 = arith.addf %10, %12 : vector<32x1xf32>
    %c0_9 = arith.constant 0 : index
    %c0_10 = arith.constant 0 : index
    %14 = vector.load %arg7[%c0_9, %c0_10] : memref<32x1xf32, #tpu.memory_space<vmem>>, vector<32x1xf32>
    tpu.vector_store %arg7[%c0_9, %c0_10], %13 {strides = array<i32>} : memref<32x1xf32, #tpu.memory_space<vmem>>, vector<32x1xf32>,
    %c0_i32_11 = arith.constant 0 : i32
    %15 = arith.cmpi eq, %arg1, %c0_i32_11 : i32
    %16 = arith.extui %15 : i1 to i32
    %c0_i32_12 = arith.constant 0 : i32
    %17 = arith.cmpi ne, %16, %c0_i32_12 : i32
    scf.if %17 {
      %c0_13 = arith.constant 0 : index
      %c0_14 = arith.constant 0 : index
      %18 = vector.load %arg4[%c0_13, %c0_14] : memref<32x128xbf16, #tpu.memory_space<vmem>>, vector<32x128xbf16>
      %19 = arith.extf %18 : vector<32x128xbf16> to vector<32x128xf32>
      %c0_15 = arith.constant 0 : index
      %c0_16 = arith.constant 0 : index
      %20 = vector.load %arg7[%c0_15, %c0_16] : memref<32x1xf32, #tpu.memory_space<vmem>>, vector<32x1xf32>
      %21 = vector.broadcast %20 : vector<32x1xf32> to vector<32x128xf32>
      %22 = arith.mulf %21, %19 : vector<32x128xf32>
      %cst_17 = arith.constant dense<0.000000e+00> : vector<128xf32>
      %23 = vector.multi_reduction <add>, %22, %cst_17 [0] : vector<32x128xf32> to vector<128xf32>
      %24 = vector.shape_cast %23 : vector<128xf32> to vector<1x128xf32>
      %c0_18 = arith.constant 0 : index
      %c0_19 = arith.constant 0 : index
      %25 = vector.load %arg5[%c0_18, %c0_19] : memref<1x128xf32, #tpu.memory_space<vmem>>, vector<1x128xf32>
      %26 = arith.addf %24, %25 : vector<1x128xf32>
      %c0_20 = arith.constant 0 : index
      %c0_21 = arith.constant 0 : index
      %c0_22 = arith.constant 0 : index
      %27 = vector.load %arg6[%c0_20, %c0_21, %c0_22] : memref<1x1x128xf32, #tpu.memory_space<vmem>>, vector<1x1x128xf32>
      %28 = vector.shape_cast %27 : vector<1x1x128xf32> to vector<1x128xf32>
      %29 = vector.shape_cast %26 : vector<1x128xf32> to vector<1x1x128xf32>
      tpu.vector_store %arg6[%c0_20, %c0_21, %c0_22], %29 {strides = array<i32>} : memref<1x1x128xf32, #tpu.memory_space<vmem>>, vector<1x1x128xf32>,
    } else {
    }
    return
  }
  func.func @transform_0(%arg0: i32, %arg1: i32) -> (i32, i32, i32) {
    %c0_i32 = arith.constant 0 : i32
    %c0_i32_0 = arith.constant 0 : i32
    return %arg0, %c0_i32, %arg1 : i32, i32, i32
  }
  func.func @transform_1(%arg0: i32, %arg1: i32) -> (i32, i32) {
    %c0_i32 = arith.constant 0 : i32
    %c0_i32_0 = arith.constant 0 : i32
    %c0_i32_1 = arith.constant 0 : i32
    return %c0_i32, %c0_i32_0 : i32, i32
  }
  func.func @transform_2(%arg0: i32, %arg1: i32) -> (i32, i32) {
    %c0_i32 = arith.constant 0 : i32
    %c0_i32_0 = arith.constant 0 : i32
    %c0_i32_1 = arith.constant 0 : i32
    return %c0_i32, %c0_i32_0 : i32, i32
  }
  func.func @transform_3(%arg0: i32, %arg1: i32) -> (i32, i32) {
    %c0_i32 = arith.constant 0 : i32
    %c0_i32_0 = arith.constant 0 : i32
    %c0_i32_1 = arith.constant 0 : i32
    return %c0_i32, %c0_i32_0 : i32, i32
  }
  func.func @transform_4(%arg0: i32, %arg1: i32) -> (i32, i32, i32) {
    %c0_i32 = arith.constant 0 : i32
    %c0_i32_0 = arith.constant 0 : i32
    %c0_i32_1 = arith.constant 0 : i32
    return %arg0, %c0_i32, %c0_i32_0 : i32, i32, i32
  }
}

</mosaic_0001>

<bundles_post_ra>
// kernel: tpu_custom_call.1
= control target key start
LH: loop header
LB: loop body
LE: loop exit
PB: predicated region body
PF: predicated region fallthrough
CT: control target
= control target key end

     0   :  { %9 = vsyncpa [#allocation4], 0  ;;  %s893_s0 = inlined_call_operand.vmem [shape: f32[2,4,256], index: 0, kind: input, shape index: {}]   ;;  %s894_s1 = inlined_call_operand.vmem [shape: bf16[32,4], index: 1, kind: input, shape index: {}]   ;;  %s895_s2 = inlined_call_operand.hbm [shape: bf16[32,128], index: 2, kind: input, shape index: {}]   ;;  %s896_s3 = inlined_call_operand.vmem [shape: f32[1,128], index: 3, kind: input, shape index: {}]   ;;  %s897_s4 = inlined_call_operand.hbm [shape: f32[2,1,128], index: 4, kind: output, shape index: {}]  }
   0x1   :  { %10 = vsyncpa [#allocation5], 0 }
   0x2   :  { %12 = vsyncpa [#allocation5 + $0x1], 0  ;;  %s756_s15 = smov 0   ;;  %s758_s16 = smov 0  }
   0x3   :  { %s760_s17 = smov 0   ;;  %s762_s18 = smov 0  }
   0x4   :  { %s764_s19 = smov 0   ;;  %s766_s20 = smov 0  }
   0x5 LB: > { %s513_s21 = sadd.s32 4294967295, %s723_s20   ;;  %s514_s22 = sadd.s32 4294967294, %s723_s20   ;;  %s723_s20 = sphi %s766_s20, %s18_s20   ;;  %s719_s19 = sphi %s764_s19, %s906_s19   ;;  %s715_s18 = sphi %s762_s18, %s905_s18   ;;  %s711_s17 = sphi %s760_s17, %s904_s17   ;;  %s707_s16 = sphi %s758_s16, %s903_s16   ;;  %s703_s15 = sphi %s756_s15, %s902_s15  }
   0x6   : > { %s30_s23 = sadd.s32 1, %s719_s19  ;;  %s128_s24 = sadd.s32 1, %s711_s17 }
   0x7   : > { %p32_p0 = scmp.ge.s32.totalorder %s30_s23, 2  ;;  %p138_p1 = scmp.ne.s32.totalorder %s711_s17, %s707_s16 }
   0x8   : > { %p139_p2 = scmp.eq.s32.totalorder %s513_s21, 1  ;;  %p144_p3 = scmp.ne.s32.totalorder %s707_s16, %s703_s15 }
   0x9   : > { %s908_s23 = smov (%p32_p0, %s30_s23), 0  ;;  %p145_p5 = scmp.eq.s32.totalorder %s514_s22, 1 }
   0xa   : > { %p796_p4 = por %p139_p2, %p138_p1  ;;  %s125_s26 = ssub.s32 %s719_s19, %s908_s23 }
   0xb   : > { %p515_p6 = scmp.ge.s32.totalorder %s723_s20, 1  ;;  %p126_p7 = scmp.eq.s32.totalorder %s125_s26, 0 }
   0xc   : > { %p803_p8 = por %p145_p5, %p144_p3  ;;  %p152_p9 = scmp.lt.s32.totalorder %s723_s20, 3 }
   0xd   : > { %s809_s28 = scalar_select %p126_p7, %s711_s17, %s128_s24  }
   0xe   : > { %p811_p10 = pnand %p515_p6, %p152_p9  ;;  %p815_p11 = scmp.eq.s32.totalorder %s513_s21, 0 }
   0xf   : > { %s725_s5 = smov [#allocation3]  }
  0x10   : > { %p548_p12 = pneg %p811_p10  ;;  %s167_s6 = sshll.u32 %s725_s5, 4  ;;  %s168_s6 = int_to_ptr.vmem [resolvable:$true] %s167_s6 }
  0x11   : > { %s628_s7 = scalar_lea.vmem %s168_s6, 256  ;;  %p636_p5 = scmp.lt.s32.totalorder %s168_s6, %s168_s6 }
  0x12   : > { %p549_p13 = pnand %p815_p11, %p548_p12  ;;  %p629_p1 = scmp.ne.s32.totalorder %s168_s6, %s628_s7 }
  0x13   : > { %p637_p6 = scmp.lt.s32.totalorder %s628_s7, %s628_s7 }
  0x14   : > { %p619_p0 = pneg %p549_p13 }
  0x15   : > { %p638_p7 = por %p637_p6, %p636_p5 }
  0x16   : > { %p631_p2 = pnand %p629_p1, %p619_p0 }
  0x18   : > { %p632_p3 = pneg %p631_p2 }
  0x1a   : > { %p639_p9 = pnand %p638_p7, %p632_p3 }
  0x1c   : > { %642 = shalt.err (!%p639_p9)
}
  0x1d   : > { %s726_s8 = smov 64   ;;  %s727_s9 = smov 4  }
  0x1e   : > { %551 = dma.hbm_to_vmem [thread:$0]  (!%p549_p13), %s895_s2, 256, %s168_s6, [#allocation4], %s726_s8, %s726_s8, %s727_s9  }
  0x1f   : > { %199 = sbr.rel (%p811_p10) target bundleno = 562 (0x232), region = 36 }
  0x24   : > { %694 = dma.done.wait (%p815_p11), [#allocation4], 256  }
  0x25   : > { %696 = vsyncadd (%p815_p11), [#allocation4], 4294967040  ;;  %p229_p12 = scmp.lt.s32.totalorder %s715_s18, 1  ;;  %v728_v0 = vmov 0   ;;  %vm275_vm0 = vcmask 1041408   ;;  %v615_v6 = vld [vmem:[%s894_s1] sm:$0xff]  }
  0x26   : > { %314 = vmatprep.mubr.bf16.mxu0 %v728_v0  ;;  %324 = vmatprep.mubr.bf16.mxu1 %v728_v0  ;;  %v616_v7 = vld [vmem:[%s894_s1 + $0x8] sm:$0xff]   ;;  %vm268_vm1 = vcmask 31744   ;;  %vm243_vm2 = vcmask 7168   ;;  %v729_v8 = vmov 0.0   ;;  %v532_v45 = vld [vmem:[#allocation3] sm:$0xff]   ;;  %s226_s5 = sand.u32 1, %s707_s16  }
  0x27   : > { %s230_s12 = scalar_select %p229_p12, %s715_s18, 1  ;;  %613 = vset.pattern.permute.xlu1 %v728_v0  ;;  %612 = vset.pattern.permute.xlu0 %v728_v0  ;;  %246 = vst.msk [vmem:[#allocation2 + $0x10] sm:$0xff] %vm243_vm2, %v729_v8  ;;  %244 = vst.msk [vmem:[#allocation2] sm:$0xff] %vm243_vm2, %v729_v8  ;;  %v539_v46 = vld [vmem:[#allocation3 + $0x8] sm:$0xff]   ;;  %v533_v48 = vunpack.c.l.bf16 %v532_v45  ;;  %v534_v49 = vunpack.c.h.bf16 %v532_v45 }
  0x28   : > { %245 = vst.msk [vmem:[#allocation2 + $0x8] sm:$0xff] %vm243_vm2, %v729_v8  ;;  %247 = vst.msk [vmem:[#allocation2 + $0x18] sm:$0xff] %vm243_vm2, %v729_v8  ;;  %v537_v51 = vunpack.c.l.bf16 %v539_v46  ;;  %v538_v55 = vunpack.c.h.bf16 %v539_v46  ;;  %s527_s8 = sshll.u32 %s715_s18, 4  ;;  %s227_s9 = scalar_lea.vmem [#allocation6], %s226_s5 }
  0x29   : > { %s530_s13 = sshll.u32 %s230_s12, 3  ;;  %s432_s10 = sshll.u32 %s227_s9, 4  ;;  %s433_s10 = int_to_ptr.vmem [resolvable:$true] %s432_s10 }
  0x2a   : > { %s236_s22 = scalar_lea.vmem %s893_s0, %s530_s13  ;;  %s430_s13 = scalar_lea.hbm %s897_s4, %s527_s8 }
  0x2b   : > { %v248_v1 = vld [vmem:[%s236_s22] sm:$0xff]  ;;  %s420_s14 = scalar_lea.sflag [#allocation5], %s226_s5  ;;  %s643_s21 = scalar_lea.vmem %s433_s10, 16 }
  0x2c   : > { %v250_v2 = vcombine.high %v248_v1, %v248_v1  ;;  %v252_v3 = vpack.c.bf16 %v248_v1, %v248_v1  ;;  %p644_p10 = scmp.ne.s32.totalorder %s433_s10, %s643_s21  ;;  %s730_s22 = smov [#allocation6]  }
  0x2d   : > { %s647_s24 = sshll.u32 %s730_s22, 4  ;;  %s648_s24 = int_to_ptr.vmem [resolvable:$false] %s647_s24 }
  0x2e   : > { %v253_v4 = vpack.c.bf16 %v250_v2, %v250_v2  ;;  %v277_v5 = vsel %vm275_vm0, %v252_v3, 0  ;;  %v345_v29 = vld [vmem:[#allocation2 + $0x10] sm:$0xff]  ;;  %v343_v30 = vld [vmem:[#allocation2] sm:$0xff]  ;;  %p645_p11 = pnand %p644_p10, %p796_p4  ;;  %s649_s18 = scalar_lea.vmem %s648_s24, 32 }
  0x2f   : > { %v346_v35 = vld [vmem:[#allocation2 + $0x18] sm:$0xff]  ;;  %v344_v36 = vld [vmem:[#allocation2 + $0x8] sm:$0xff]  ;;  %v416_v3 = vld [vmem:[%s896_s3] sm:$0x1]  ;;  %p650_p0 = scmp.lt.s32.totalorder %s433_s10, %s648_s24  ;;  %p651_p1 = scmp.lt.s32.totalorder %s649_s18, %s643_s21 }
  0x30   : > { %524 = vmatprep.subr.msk.bf16.mxu0 %vm275_vm0, %v253_v4  ;;  %540 = vmatprep.subr.msk.bf16.mxu1 %vm275_vm0, %v253_v4  ;;  %p646_p13 = pneg %p645_p11 }
  0x31   : > { %297 = vmatpush1.bf16.msra.mxu0 %v277_v5  ;;  %541 = vmatpush1.bf16.msra.mxu1 %v277_v5  ;;  %p652_p2 = por %p651_p1, %p650_p0 }
  0x33   : > { %p653_p3 = pnand %p652_p2, %p646_p13 }
  0x34   : > { %525 = vmatmul.mubr.msk.bf16.vlgmr.msra.gmra.mxu0 %vm268_vm1, %v615_v6  ;;  %526 = vmatmul.mubr.msk.bf16.vlgmr.msra.gmra.mxu1 %vm268_vm1, %v616_v7 }
  0xf4   : > { %v316_v9 = vpop.f32.mrf.mxu0  ;;  %v326_v10 = vpop.f32.mrf.mxu1 }
  0xf5   : > { %v335_v13 = vmax.f32 %v316_v9, 0.0  ;;  %v339_v14 = vmax.f32 %v326_v10, 0.0 }
  0xf6   : > { %v318_v11 = vpop.f32.mrf.mxu0  ;;  %v328_v12 = vpop.f32.mrf.mxu1 }
  0xf7   : > { %v336_v15 = vmax.f32 %v318_v11, 0.0  ;;  %v340_v16 = vmax.f32 %v328_v12, 0.0 }
  0xf8   : > { %v320_v17 = vpop.f32.mrf.mxu0  ;;  %v330_v18 = vpop.f32.mrf.mxu1 }
  0xf9   : > { %v353_v19 = vadd.f32 %v340_v16, %v339_v14  ;;  %v347_v20 = vadd.f32 %v336_v15, %v335_v13  ;;  %v337_v23 = vmax.f32 %v320_v17, 0.0  ;;  %v341_v24 = vmax.f32 %v330_v18, 0.0 }
  0xfa   : > { %v322_v21 = vpop.f32.mrf.mxu0  ;;  %v332_v22 = vpop.f32.mrf.mxu1 }
  0xfb   : > { %v338_v25 = vmax.f32 %v322_v21, 0.0  ;;  %v342_v26 = vmax.f32 %v332_v22, 0.0  ;;  %354 = vadd.xlane.f32.xlu1 %v353_v19  ;;  %348 = vadd.xlane.f32.xlu0 %v347_v20 }
  0xfd   : > { %v356_v27 = vadd.f32 %v342_v26, %v341_v24  ;;  %v350_v28 = vadd.f32 %v338_v25, %v337_v23 }
  0xff   : > { %357 = vadd.xlane.f32.xlu1 %v356_v27  ;;  %351 = vadd.xlane.f32.xlu0 %v350_v28 }
 0x184   : > { %v355_v31 = vpop.xlane.xlu1 %354  ;;  %v349_v32 = vpop.xlane.xlu0 %348 }
 0x185   : > { %v361_v33 = vadd.f32 %v355_v31, %v345_v29  ;;  %v359_v34 = vadd.f32 %v349_v32, %v343_v30 }
 0x187   : > { %366 = vst.msk [vmem:[#allocation2 + $0x10] sm:$0xff] %vm243_vm2, %v361_v33  ;;  %364 = vst.msk [vmem:[#allocation2] sm:$0xff] %vm243_vm2, %v359_v34 }
 0x188   : > { %v358_v37 = vpop.xlane.xlu1 %357  ;;  %v352_v38 = vpop.xlane.xlu0 %351 }
 0x189   : > { %v362_v39 = vadd.f32 %v358_v37, %v346_v35  ;;  %v360_v40 = vadd.f32 %v352_v38, %v344_v36 }
 0x18b   : > { %367 = vst.msk [vmem:[#allocation2 + $0x18] sm:$0xff] %vm243_vm2, %v362_v39  ;;  %365 = vst.msk [vmem:[#allocation2 + $0x8] sm:$0xff] %vm243_vm2, %v360_v40 }
 0x18e   : > { %v381_v41 = vld [vmem:[#allocation2 + $0x10] sm:$0xff]  ;;  %v379_v42 = vld [vmem:[#allocation2] sm:$0xff] }
 0x18f   : > { %395 = vperm.xlu1 %613, %v381_v41   ;;  %385 = vperm.xlu0 %612, %v379_v42  }
 0x192   : > { %v380_v43 = vld [vmem:[#allocation2 + $0x8] sm:$0xff]  ;;  %v382_v44 = vld [vmem:[#allocation2 + $0x18] sm:$0xff] }
 0x193   : > { %390 = vperm.xlu1 %613, %v380_v43  }
 0x197   : > { %400 = vperm.xlu1 %613, %v382_v44  }
 0x20a   : > { %v396_v47 = vpop.permute.xlu1 %395  ;;  %v386_v50 = vpop.permute.xlu0 %385 }
 0x20b   : > { %v403_v53 = vmul.f32 %v533_v48, %v386_v50  ;;  %v405_v56 = vmul.f32 %v537_v51, %v396_v47 }
 0x20e   : > { %v391_v52 = vpop.permute.xlu1 %390 }
 0x20f   : > { %v404_v54 = vmul.f32 %v534_v49, %v391_v52 }
 0x211   : > { %v407_v57 = vadd.f32 %v404_v54, %v403_v53 }
 0x212   : > { %v401_v58 = vpop.permute.xlu1 %400 }
 0x213   : > { %v406_v59 = vmul.f32 %v538_v55, %v401_v58  ;;  %v408_v60 = vadd.f32 %v407_v57, %v405_v56 }
 0x215   : > { %v409_v61 = vadd.f32 %v408_v60, %v406_v59 }
 0x217   : > { %v410_v62 = vrot.slane %v409_v61, 4 }
 0x219   : > { %v411_v63 = vadd.f32 %v410_v62, %v409_v61 }
 0x21b   : > { %v412_v0 = vrot.slane %v411_v63, 2 }
 0x21d   : > { %v413_v1 = vadd.f32 %v412_v0, %v411_v63 }
 0x21f   : > { %v414_v2 = vrot.slane %v413_v1, 1 }
 0x221   : > { %v415_v4 = vadd.f32 %v414_v2, %v413_v1 }
 0x223   : > { %v417_v5 = vadd.f32 %v416_v3, %v415_v4 }
 0x225   : > { %418 = vst [vmem:[%s227_s9] sm:$0x1] %v417_v5 }
 0x226   : > { %656 = shalt.err (!%p653_p3)
}
 0x227   : > { %s657_s26 = scalar_lea.hbm %s430_s13, 16  ;;  %s661_s5 = scalar_lea.hbm %s897_s4, 32 }
 0x228   : > { %p658_p5 = scmp.ne.s32.totalorder %s430_s13, %s657_s26  ;;  %p662_p9 = scmp.lt.s32.totalorder %s430_s13, %s897_s4 }
 0x229   : > { %p663_p12 = scmp.lt.s32.totalorder %s661_s5, %s657_s26 }
 0x22a   : > { %p659_p6 = pnand %p658_p5, %p796_p4 }
 0x22b   : > { %p664_p10 = por %p663_p12, %p662_p9 }
 0x22c   : > { %p660_p7 = pneg %p659_p6 }
 0x22e   : > { %p665_p11 = pnand %p664_p10, %p660_p7 }
 0x230   : > { %668 = shalt.err (!%p665_p11)
}
 0x231   : > { %546 = dma.vmem_to_hbm [thread:$0]  (%p796_p4), %s433_s10, 16, %s430_s13, %s420_s14  }
 0x232 PF: > { %p558_p13 = scmp.ge.s32.totalorder %s723_s20, 2  ;;  %s444_s8 = sand.u32 1, %s703_s15  }
 0x233   : > { %s445_s9 = scalar_lea.sflag [#allocation5], %s444_s8 }
 0x234   : > { %p553_p0 = pnand %p558_p13, %p803_p8 }
 0x236   : > { %p554_p1 = pneg %p553_p0 }
 0x238   : > { %698 = dma.done.wait (%p554_p1), %s445_s9, 16  }
 0x239   : > { %700 = vsyncadd (%p554_p1), %s445_s9, 4294967280  ;;  %s18_s20 = sadd.s32 1, %s723_s20   ;;  %s902_s15 = smov %s707_s16 }
 0x23a   : > { %p15_p2 = scmp.ge.s32.totalorder %s18_s20, 4   ;;  %s903_s16 = smov %s711_s17 }
 0x23b   : > { %s904_s17 = smov %s809_s28  ;;  %s905_s18 = smov %s719_s19 }
 0x23c   : > { %s906_s19 = smov %s908_s23  ;;  %17 = sbr.rel (!%p15_p2) target bundleno = 5 (0x5), region = 84 }
 0x241   :  { %449 = vsyncpa [#allocation4], 1 }
 0x242   :  { %451 = vsyncpa [#allocation4 + $0x1], 1 }
 0x243   :  { %452 = vsyncpa [#allocation5], 1 }
 0x244   :  { %454 = vsyncpa [#allocation5 + $0x1], 1 }

</bundles_post_ra>
